<compile_context>
chip_gen: v7x
topology: tpu7x:2x2x1
jax: 0.10.0
libtpu: 0.0.40
codegen_flags: <defaults>
</compile_context>

<pallas_src>
import numpy as np
import jax
import jax.numpy as jnp
from jax import lax
from jax.experimental import pallas as pl
from jax.experimental.pallas import tpu as pltpu


def _fused_kernel(filt_ref, slabs_ref, fkr_ref, fki_ref, fre_ref, fim_ref,
                  out_u_ref, out_fr_ref, out_fi_ref):
    """Fused FeatureExtraction body.

    filt_ref : VMEM (K, 9)          3x3 filter taps, row-major
    slabs_ref: VMEM (9, N*H*W)      im2col slabs of the zero-padded image planes
    fkr_ref  : VMEM (K, H*W)        real part of fft2(pad(filter_k))
    fki_ref  : VMEM (K, H*W)        imag part
    fre_ref  : VMEM (M, H*W)        real part of k-space planes (M = B*C)
    fim_ref  : VMEM (M, H*W)        imag part
    out_u_ref: VMEM (K, N*H*W)      conv branch output (lane-dense)
    out_fr_ref, out_fi_ref: VMEM (K, M, H*W)
    """
    # ---- conv branch: one tiny MXU matmul, lane-dense output -----------------
    out_u_ref[...] = jnp.dot(filt_ref[...], slabs_ref[...],
                             preferred_element_type=jnp.float32)

    # ---- complex-multiply branch: lane-dense elementwise on the VPU ----------
    fkr = fkr_ref[...][:, None, :]     # (K, 1, L)
    fki = fki_ref[...][:, None, :]
    fre = fre_ref[...][None, :, :]     # (1, M, L)
    fim = fim_ref[...][None, :, :]
    out_fr_ref[...] = fkr * fre - fki * fim
    out_fi_ref[...] = fkr * fim + fki * fre


def feature_extraction_forward(inputs, filters):
    u = inputs['u_t']            # (B, H, W, 2)
    f = inputs['f']              # (B, C, H, W, 2)
    c = inputs['coil_sens']      # (B, C, H, W, 2)
    m = inputs['sampling_mask']  # (B, H, W)

    B, H, W, _ = u.shape
    _, C, Hf, Wf, _ = f.shape
    assert (Hf, Wf) == (H, W)
    K = filters.shape[0]
    N, M, L = B * 2, B * C, H * W

    # ---- plain-JAX glue -------------------------------------------------------
    # fft of zero-padded filters (ZeroPad2d((0, W-3, 0, H-3)) then torch.fft.fft2)
    padded = jnp.pad(filters, ((0, 0), (0, H - 3), (0, W - 3)))
    fft_k = jnp.fft.fft2(padded)                               # (K, H, W) complex64
    fkr = jnp.real(fft_k).reshape(K, L).astype(jnp.float32)    # lane-dense (K, H*W)
    fki = jnp.imag(fft_k).reshape(K, L).astype(jnp.float32)

    # im2col of the real/imag image planes: 9 shifted slabs, flattened lane-dense.
    u_nc = jnp.transpose(u, (0, 3, 1, 2)).reshape(N, H, W)     # (B*2, H, W)
    u_pad = jnp.pad(u_nc, ((0, 0), (1, 1), (1, 1)))            # (B*2, H+2, W+2)
    slabs = jnp.stack(
        [u_pad[:, dy:dy + H, dx:dx + W] for dy in range(3) for dx in range(3)],
        axis=0,
    ).reshape(9, N * H * W).astype(jnp.float32)                # (9, N*H*W)

    f_re = f[..., 0].reshape(M, L).astype(jnp.float32)         # lane-dense (M, H*W)
    f_im = f[..., 1].reshape(M, L).astype(jnp.float32)

    filters_mat = filters.reshape(K, 9).astype(jnp.float32)    # (K, 9) for the MXU

    # ---- single fused pallas_call (whole-block, no grid) ----------------------
    vmem = pl.BlockSpec(memory_space=pltpu.MemorySpace.VMEM)
    out_u_flat, out_fr, out_fi = pl.pallas_call(
        _fused_kernel,
        out_shape=(
            jax.ShapeDtypeStruct((K, N * H * W), jnp.float32),
            jax.ShapeDtypeStruct((K, M, L), jnp.float32),
            jax.ShapeDtypeStruct((K, M, L), jnp.float32),
        ),
        in_specs=[vmem] * 6,
        out_specs=(vmem, vmem, vmem),
    )(filters_mat, slabs, fkr, fki, f_re, f_im)

    # ---- glue back to the PyTorch output conventions (one transpose per branch)
    out_u = out_u_flat.reshape(K, B, 2, H, W).transpose(1, 0, 3, 4, 2)       # (B,K,H,W,2)
    out_f = jnp.stack([out_fr, out_fi], axis=-1)                             # (K,M,L,2)
    out_f = out_f.reshape(K, B, C, H, W, 2).transpose(1, 0, 2, 3, 4, 5)      # (B,K,C,H,W,2)

    return {
        'u_t': out_u,                 # (B, 4, H, W, 2)
        'f': out_f,                   # (B, 4, C, H, W, 2)
        'coil_sens': c[:, None],      # (B, 1, C, H, W, 2)  (unsqueeze(1))
        'sampling_mask': m[:, None],  # (B, 1, H, W)         (unsqueeze(1))
        'kernel': filters,
    }


if __name__ == "__main__":
    key = jax.random.PRNGKey(0)
    B, C, H, W = 2, 4, 16, 16
    K = 4  # num_features (the module defines exactly 4 filter kernels)

    k_u, k_f, k_c, k_m, k_w = jax.random.split(key, 5)

    # Deterministic parameter init mirroring __init__:
    #   kernel 0 = fixed 3x3 identity (delta), kernels 1..3 ~ U[-1, 1)
    filt0 = jnp.zeros((3, 3), jnp.float32).at[1, 1].set(1.0)
    filt_rest = jax.random.uniform(k_w, (K - 1, 3, 3), jnp.float32, -1.0, 1.0)
    filters = jnp.concatenate([filt0[None], filt_rest], axis=0)

    inputs = {
        'u_t': jax.random.normal(k_u, (B, H, W, 2), jnp.float32),
        'f': jax.random.normal(k_f, (B, C, H, W, 2), jnp.float32),
        'coil_sens': jax.random.normal(k_c, (B, C, H, W, 2), jnp.float32),
        'sampling_mask': (jax.random.uniform(k_m, (B, H, W)) > 0.5).astype(jnp.float32),
    }

    out = jax.jit(feature_extraction_forward)(inputs, filters)
    out = jax.tree_util.tree_map(jax.block_until_ready, out)

    # Light correctness check vs plain-JAX reference.
    u = inputs['u_t']
    f = inputs['f']
    lhs = jnp.transpose(u, (0, 3, 1, 2)).reshape(B * 2, 1, H, W)
    rhs = filters[:, None]                                   # (K,1,3,3)
    conv_ref = lax.conv_general_dilated(lhs, rhs, (1, 1), 'SAME',
                                        precision=lax.Precision.HIGHEST)     # (B*2,K,H,W)
    conv_ref = conv_ref.reshape(B, 2, K, H, W).transpose(0, 2, 3, 4, 1)      # (B,K,H,W,2)
    np.testing.assert_allclose(np.asarray(out['u_t']), np.asarray(conv_ref),
                               rtol=1e-3, atol=1e-3)

    padded = jnp.pad(filters, ((0, 0), (0, H - 3), (0, W - 3)))
    fft_k = jnp.fft.fft2(padded)                             # (K,H,W)
    f_c = f[..., 0] + 1j * f[..., 1]                         # (B,C,H,W)
    ref_f = fft_k[None, :, None] * f_c[:, None]              # (B,K,C,H,W)
    ref_f = jnp.stack([jnp.real(ref_f), jnp.imag(ref_f)], axis=-1).astype(jnp.float32)
    np.testing.assert_allclose(np.asarray(out['f']), np.asarray(ref_f),
                               rtol=1e-3, atol=1e-3)

    print("KERNEL_OK")
</pallas_src>

<mosaic_0001>
module attributes {stable_mosaic.version = 11 : i64} {
  func.func @_fused_kernel(%arg0: memref<4x9xf32, #tpu.memory_space<vmem>>, %arg1: memref<9x1024xf32, #tpu.memory_space<vmem>>, %arg2: memref<4x256xf32, #tpu.memory_space<vmem>>, %arg3: memref<4x256xf32, #tpu.memory_space<vmem>>, %arg4: memref<8x256xf32, #tpu.memory_space<vmem>>, %arg5: memref<8x256xf32, #tpu.memory_space<vmem>>, %arg6: memref<4x1024xf32, #tpu.memory_space<vmem>>, %arg7: memref<4x8x256xf32, #tpu.memory_space<vmem>>, %arg8: memref<4x8x256xf32, #tpu.memory_space<vmem>>) attributes {dimension_semantics = [], scalar_prefetch = 0 : i64, scratch_operands = 0 : i64, tpu.core_type = #tpu.core_type<tc>} {
    %c0 = arith.constant 0 : index
    %c0_0 = arith.constant 0 : index
    %0 = vector.load %arg0[%c0, %c0_0] : memref<4x9xf32, #tpu.memory_space<vmem>>, vector<4x9xf32>
    %c0_1 = arith.constant 0 : index
    %c0_2 = arith.constant 0 : index
    %1 = vector.load %arg1[%c0_1, %c0_2] : memref<9x1024xf32, #tpu.memory_space<vmem>>, vector<9x1024xf32>
    %cst = arith.constant dense<0.000000e+00> : vector<4x1024xf32>
    %2 = tpu.matmul %0, %1, %cst {dimension_numbers = #tpu.dot_dimension_numbers<[1], [0], [0], [1], [0, 0, 1, 1], [], []>} : vector<4x9xf32>, vector<9x1024xf32>, vector<4x1024xf32> -> vector<4x1024xf32>
    %c0_3 = arith.constant 0 : index
    %c0_4 = arith.constant 0 : index
    %3 = vector.load %arg6[%c0_3, %c0_4] : memref<4x1024xf32, #tpu.memory_space<vmem>>, vector<4x1024xf32>
    tpu.vector_store %arg6[%c0_3, %c0_4], %2 {strides = array<i32>} : memref<4x1024xf32, #tpu.memory_space<vmem>>, vector<4x1024xf32>,
    %c0_5 = arith.constant 0 : index
    %c0_6 = arith.constant 0 : index
    %4 = vector.load %arg2[%c0_5, %c0_6] : memref<4x256xf32, #tpu.memory_space<vmem>>, vector<4x256xf32>
    %5 = vector.shape_cast %4 : vector<4x256xf32> to vector<4x1x256xf32>
    %c0_7 = arith.constant 0 : index
    %c0_8 = arith.constant 0 : index
    %6 = vector.load %arg3[%c0_7, %c0_8] : memref<4x256xf32, #tpu.memory_space<vmem>>, vector<4x256xf32>
    %7 = vector.shape_cast %6 : vector<4x256xf32> to vector<4x1x256xf32>
    %c0_9 = arith.constant 0 : index
    %c0_10 = arith.constant 0 : index
    %8 = vector.load %arg4[%c0_9, %c0_10] : memref<8x256xf32, #tpu.memory_space<vmem>>, vector<8x256xf32>
    %9 = vector.shape_cast %8 : vector<8x256xf32> to vector<1x8x256xf32>
    %c0_11 = arith.constant 0 : index
    %c0_12 = arith.constant 0 : index
    %10 = vector.load %arg5[%c0_11, %c0_12] : memref<8x256xf32, #tpu.memory_space<vmem>>, vector<8x256xf32>
    %11 = vector.shape_cast %10 : vector<8x256xf32> to vector<1x8x256xf32>
    %12 = vector.broadcast %5 : vector<4x1x256xf32> to vector<4x8x256xf32>
    %13 = vector.broadcast %9 : vector<1x8x256xf32> to vector<4x8x256xf32>
    %14 = arith.mulf %12, %13 : vector<4x8x256xf32>
    %15 = vector.broadcast %7 : vector<4x1x256xf32> to vector<4x8x256xf32>
    %16 = vector.broadcast %11 : vector<1x8x256xf32> to vector<4x8x256xf32>
    %17 = arith.mulf %15, %16 : vector<4x8x256xf32>
    %18 = arith.subf %14, %17 : vector<4x8x256xf32>
    %c0_13 = arith.constant 0 : index
    %c0_14 = arith.constant 0 : index
    %c0_15 = arith.constant 0 : index
    %19 = vector.load %arg7[%c0_13, %c0_14, %c0_15] : memref<4x8x256xf32, #tpu.memory_space<vmem>>, vector<4x8x256xf32>
    tpu.vector_store %arg7[%c0_13, %c0_14, %c0_15], %18 {strides = array<i32>} : memref<4x8x256xf32, #tpu.memory_space<vmem>>, vector<4x8x256xf32>,
    %20 = vector.broadcast %5 : vector<4x1x256xf32> to vector<4x8x256xf32>
    %21 = vector.broadcast %11 : vector<1x8x256xf32> to vector<4x8x256xf32>
    %22 = arith.mulf %20, %21 : vector<4x8x256xf32>
    %23 = vector.broadcast %7 : vector<4x1x256xf32> to vector<4x8x256xf32>
    %24 = vector.broadcast %9 : vector<1x8x256xf32> to vector<4x8x256xf32>
    %25 = arith.mulf %23, %24 : vector<4x8x256xf32>
    %26 = arith.addf %22, %25 : vector<4x8x256xf32>
    %c0_16 = arith.constant 0 : index
    %c0_17 = arith.constant 0 : index
    %c0_18 = arith.constant 0 : index
    %27 = vector.load %arg8[%c0_16, %c0_17, %c0_18] : memref<4x8x256xf32, #tpu.memory_space<vmem>>, vector<4x8x256xf32>
    tpu.vector_store %arg8[%c0_16, %c0_17, %c0_18], %26 {strides = array<i32>} : memref<4x8x256xf32, #tpu.memory_space<vmem>>, vector<4x8x256xf32>,
    return
  }
}

</mosaic_0001>

<bundles_post_ra>
// kernel: squeeze.2
= control target key start
LH: loop header
LB: loop body
LE: loop exit
PB: predicated region body
PF: predicated region fallthrough
CT: control target
= control target key end

     0   :  { %vm35_vm0 = vcmask 1043458   ;;  %vm40_vm1 = vcmask 1045508   ;;  %vm45_vm2 = vcmask 1047558   ;;  %s75_s6 = smov 3  ;;  %s78_s7 = smov 12  ;;  %vm4_vm3 = vcmask 1047556   ;;  %s738_s0 = inlined_call_operand.vmem [shape: f32[2,4,16,16], index: 0, kind: input, shape index: {}]   ;;  %s739_s1 = inlined_call_operand.vmem [shape: f32[8,256], index: 1, kind: output, shape index: {}]  }
   0x1   :  { %v362_v0 = vld [vmem:[%s738_s0 + $0x6] ss:$16 sm:%s75_s6]   ;;  %s83_s12 = smov 48  ;;  %s88_s13 = smov 192  ;;  %vm6_vm4 = vcmask 130048   ;;  %vm49_vm5 = vcmask 1048448  }
   0x2   :  { %v363_v1 = vld [vmem:[%s738_s0 + $0x6] ss:$16 sm:%s78_s7]   ;;  %s30_s18 = smov 3  ;;  %s33_s21 = smov 12  ;;  %vm94_vm6 = vcmask 917248   ;;  %vm139_vm7 = vcmask 786048  }
   0x3   :  { %v81_v2 = vsel %vm35_vm0, %v363_v1, %v362_v0  ;;  %v364_v3 = vld [vmem:[%s738_s0 + $0x6] ss:$16 sm:%s83_s12]   ;;  %v353_v6 = vld [vmem:[%s738_s0 + $0x7] ss:$16 sm:%s30_s18]   ;;  %s38_s22 = smov 48  ;;  %s43_s27 = smov 192 }
   0x4   :  { %v365_v4 = vld [vmem:[%s738_s0 + $0x6] ss:$16 sm:%s88_s13]   ;;  %v86_v5 = vsel %vm40_vm1, %v364_v3, %v81_v2  ;;  %v354_v8 = vld [vmem:[%s738_s0 + $0x7] ss:$16 sm:%s33_s21]   ;;  %s423_s28 = smov 96   ;;  %s97_s2 = smov 3 }
   0x5   :  { %v91_v7 = vsel %vm45_vm2, %v365_v4, %v86_v5  ;;  %v355_v9 = vld [vmem:[%s738_s0 + $0x7] ss:$16 sm:%s38_s22]   ;;  %v36_v10 = vsel %vm35_vm0, %v354_v8, %v353_v6  ;;  %s100_s3 = smov 12  ;;  %v366_v13 = vld [vmem:[%s738_s0 + $0xe] ss:$16 sm:%s97_s2]   ;;  %s105_s8 = smov 48 }
   0x6   :  { %92 = vrot.lane.b32.xlu1 %v91_v7, %s423_s28  ;;  %v356_v11 = vld [vmem:[%s738_s0 + $0x7] ss:$16 sm:%s43_s27]   ;;  %v41_v12 = vsel %vm40_vm1, %v355_v9, %v36_v10  ;;  %s110_s9 = smov 192  ;;  %s52_s14 = smov 3  ;;  %vm184_vm8 = vcmask 654848   ;;  %vm229_vm9 = vcmask 523648  }
   0x7   :  { %v367_v14 = vld [vmem:[%s738_s0 + $0xe] ss:$16 sm:%s100_s3]   ;;  %v46_v15 = vsel %vm45_vm2, %v356_v11, %v41_v12  ;;  %s55_s15 = smov 12  ;;  %s424_s16 = smov 112   ;;  %v357_v20 = vld [vmem:[%s738_s0 + $0xf] ss:$16 sm:%s52_s14]  }
   0x8   :  { %v103_v16 = vsel %vm35_vm0, %v367_v14, %v366_v13  ;;  %v368_v17 = vld [vmem:[%s738_s0 + $0xe] ss:$16 sm:%s105_s8]   ;;  %47 = vrot.lane.b32.xlu0 %v46_v15, %s424_s16  ;;  %s60_s19 = smov 48  ;;  %s65_s20 = smov 192  ;;  %vm274_vm10 = vcmask 392448   ;;  %vm319_vm11 = vcmask 261248  }
   0x9   :  { %v369_v18 = vld [vmem:[%s738_s0 + $0xe] ss:$16 sm:%s110_s9]   ;;  %v108_v19 = vsel %vm40_vm1, %v368_v17, %v103_v16  ;;  %v358_v22 = vld [vmem:[%s738_s0 + $0xf] ss:$16 sm:%s55_s15]   ;;  %s142_s25 = smov 3  ;;  %s150_s29 = smov 48 }
   0xa   :  { %v113_v21 = vsel %vm45_vm2, %v369_v18, %v108_v19  ;;  %v359_v23 = vld [vmem:[%s738_s0 + $0xf] ss:$16 sm:%s60_s19]   ;;  %v58_v24 = vsel %vm35_vm0, %v358_v22, %v357_v20  ;;  %v375_v27 = vld [vmem:[%s738_s0 + $0xd] ss:$16 sm:%s142_s25]   ;;  %s155_s5 = smov 192  ;;  %s120_s6 = smov 3 }
   0xb   :  { %114 = vrot.lane.b32.xlu1 %v113_v21, %s423_s28  ;;  %v360_v25 = vld [vmem:[%s738_s0 + $0xf] ss:$16 sm:%s65_s20]   ;;  %s145_s28 = smov 12  ;;  %v63_v26 = vsel %vm40_vm1, %v359_v23, %v58_v24  ;;  %s123_s11 = smov 12 }
   0xc   :  { %v376_v28 = vld [vmem:[%s738_s0 + $0xd] ss:$16 sm:%s145_s28]   ;;  %v68_v29 = vsel %vm45_vm2, %v360_v25, %v63_v26  ;;  %s128_s12 = smov 48  ;;  %v371_v34 = vld [vmem:[%s738_s0 + $0x5] ss:$16 sm:%s120_s6]   ;;  %s133_s15 = smov 192 }
   0xd   :  { %v148_v30 = vsel %vm35_vm0, %v376_v28, %v375_v27  ;;  %v377_v31 = vld [vmem:[%s738_s0 + $0xd] ss:$16 sm:%s150_s29]   ;;  %69 = vrot.lane.b32.xlu0 %v68_v29, %s424_s16  ;;  %s187_s20 = smov 3  ;;  %s190_s21 = smov 12 }
   0xe   :  { %v378_v32 = vld [vmem:[%s738_s0 + $0xd] ss:$16 sm:%s155_s5]   ;;  %v153_v33 = vsel %vm40_vm1, %v377_v31, %v148_v30  ;;  %v372_v36 = vld [vmem:[%s738_s0 + $0x5] ss:$16 sm:%s123_s11]   ;;  %s425_s22 = smov 80   ;;  %s195_s25 = smov 48 }
   0xf   :  { %v158_v35 = vsel %vm45_vm2, %v378_v32, %v153_v33  ;;  %v373_v37 = vld [vmem:[%s738_s0 + $0x5] ss:$16 sm:%s128_s12]   ;;  %v126_v38 = vsel %vm35_vm0, %v372_v36, %v371_v34  ;;  %s200_s26 = smov 192  ;;  %v384_v41 = vld [vmem:[%s738_s0 + $0xc] ss:$16 sm:%s187_s20]   ;;  %s165_s2 = smov 3 }
  0x10   :  { %159 = vrot.lane.b32.xlu1 %v158_v35, %s425_s22  ;;  %v374_v39 = vld [vmem:[%s738_s0 + $0x5] ss:$16 sm:%s133_s15]   ;;  %v131_v40 = vsel %vm40_vm1, %v373_v37, %v126_v38  ;;  %s168_s3 = smov 12  ;;  %s173_s8 = smov 48 }
  0x11   :  { %v385_v42 = vld [vmem:[%s738_s0 + $0xc] ss:$16 sm:%s190_s21]   ;;  %v136_v43 = vsel %vm45_vm2, %v374_v39, %v131_v40  ;;  %s178_s9 = smov 192  ;;  %v380_v48 = vld [vmem:[%s738_s0 + $0x4] ss:$16 sm:%s165_s2]   ;;  %s232_s12 = smov 3 }
  0x12   :  { %v193_v44 = vsel %vm35_vm0, %v385_v42, %v384_v41  ;;  %v386_v45 = vld [vmem:[%s738_s0 + $0xc] ss:$16 sm:%s195_s25]   ;;  %137 = vrot.lane.b32.xlu0 %v136_v43, %s425_s22  ;;  %s235_s17 = smov 12  ;;  %s240_s18 = smov 48 }
  0x13   :  { %v387_v46 = vld [vmem:[%s738_s0 + $0xc] ss:$16 sm:%s200_s26]   ;;  %v198_v47 = vsel %vm40_vm1, %v386_v45, %v193_v44  ;;  %v381_v50 = vld [vmem:[%s738_s0 + $0x4] ss:$16 sm:%s168_s3]   ;;  %s426_s19 = smov 64   ;;  %s245_s22 = smov 192 }
  0x14   :  { %v203_v49 = vsel %vm45_vm2, %v387_v46, %v198_v47  ;;  %v382_v51 = vld [vmem:[%s738_s0 + $0x4] ss:$16 sm:%s173_s8]   ;;  %v171_v52 = vsel %vm35_vm0, %v381_v50, %v380_v48  ;;  %s210_s23 = smov 3  ;;  %v393_v55 = vld [vmem:[%s738_s0 + $0xb] ss:$16 sm:%s232_s12]   ;;  %s213_s28 = smov 12 }
  0x15   :  { %204 = vrot.lane.b32.xlu1 %v203_v49, %s426_s19  ;;  %v383_v53 = vld [vmem:[%s738_s0 + $0x4] ss:$16 sm:%s178_s9]   ;;  %v176_v54 = vsel %vm40_vm1, %v382_v51, %v171_v52  ;;  %s218_s29 = smov 48  ;;  %s223_s5 = smov 192 }
  0x16   :  { %v394_v56 = vld [vmem:[%s738_s0 + $0xb] ss:$16 sm:%s235_s17]   ;;  %v181_v57 = vsel %vm45_vm2, %v383_v53, %v176_v54  ;;  %v389_v62 = vld [vmem:[%s738_s0 + $0x3] ss:$16 sm:%s210_s23]   ;;  %s277_s8 = smov 3  ;;  %s280_s9 = smov 12 }
  0x17   :  { %v238_v58 = vsel %vm35_vm0, %v394_v56, %v393_v55  ;;  %v395_v59 = vld [vmem:[%s738_s0 + $0xb] ss:$16 sm:%s240_s18]   ;;  %182 = vrot.lane.b32.xlu0 %v181_v57, %s426_s19  ;;  %s285_s14 = smov 48  ;;  %s290_s15 = smov 192 }
  0x18   :  { %v396_v60 = vld [vmem:[%s738_s0 + $0xb] ss:$16 sm:%s245_s22]   ;;  %v243_v61 = vsel %vm40_vm1, %v395_v59, %v238_v58  ;;  %v390_v0 = vld [vmem:[%s738_s0 + $0x3] ss:$16 sm:%s213_s28]   ;;  %s427_s16 = smov 48   ;;  %s255_s19 = smov 3 }
  0x19   :  { %v248_v63 = vsel %vm45_vm2, %v396_v60, %v243_v61  ;;  %v391_v1 = vld [vmem:[%s738_s0 + $0x3] ss:$16 sm:%s218_s29]   ;;  %v216_v2 = vsel %vm35_vm0, %v390_v0, %v389_v62  ;;  %v402_v5 = vld [vmem:[%s738_s0 + $0xa] ss:$16 sm:%s277_s8]   ;;  %s258_s24 = smov 12  ;;  %s263_s25 = smov 48 }
  0x1a   :  { %249 = vrot.lane.b32.xlu1 %v248_v63, %s427_s16  ;;  %v392_v3 = vld [vmem:[%s738_s0 + $0x3] ss:$16 sm:%s223_s5]   ;;  %v221_v4 = vsel %vm40_vm1, %v391_v1, %v216_v2  ;;  %s268_s30 = smov 192  ;;  %s322_s4 = smov 3 }
  0x1b   :  { %v403_v6 = vld [vmem:[%s738_s0 + $0xa] ss:$16 sm:%s280_s9]   ;;  %v226_v7 = vsel %vm45_vm2, %v392_v3, %v221_v4  ;;  %v398_v12 = vld [vmem:[%s738_s0 + $0x2] ss:$16 sm:%s255_s19]   ;;  %s325_s5 = smov 12  ;;  %s330_s10 = smov 48 }
  0x1c   :  { %v283_v8 = vsel %vm35_vm0, %v403_v6, %v402_v5  ;;  %v404_v9 = vld [vmem:[%s738_s0 + $0xa] ss:$16 sm:%s285_s14]   ;;  %227 = vrot.lane.b32.xlu0 %v226_v7, %s427_s16  ;;  %s335_s11 = smov 192  ;;  %s428_s12 = smov 32  }
  0x1d   :  { %v405_v10 = vld [vmem:[%s738_s0 + $0xa] ss:$16 sm:%s290_s15]   ;;  %v288_v11 = vsel %vm40_vm1, %v404_v9, %v283_v8  ;;  %v399_v14 = vld [vmem:[%s738_s0 + $0x2] ss:$16 sm:%s258_s24]   ;;  %s300_s15 = smov 3  ;;  %s303_s20 = smov 12 }
  0x1e   :  { %v293_v13 = vsel %vm45_vm2, %v405_v10, %v288_v11  ;;  %v400_v15 = vld [vmem:[%s738_s0 + $0x2] ss:$16 sm:%s263_s25]   ;;  %v261_v16 = vsel %vm35_vm0, %v399_v14, %v398_v12  ;;  %v411_v19 = vld [vmem:[%s738_s0 + $0x9] ss:$16 sm:%s322_s4]   ;;  %s308_s21 = smov 48  ;;  %s313_s26 = smov 192 }
  0x1f   :  { %294 = vrot.lane.b32.xlu1 %v293_v13, %s428_s12  ;;  %v401_v17 = vld [vmem:[%s738_s0 + $0x2] ss:$16 sm:%s268_s30]   ;;  %v266_v18 = vsel %vm40_vm1, %v400_v15, %v261_v16  ;;  %v2_v27 = vld [vmem:[%s738_s0] ss:$8 sm:$0xf]   ;;  %s429_s6 = smov 16  }
  0x20   :  { %v412_v20 = vld [vmem:[%s738_s0 + $0x9] ss:$16 sm:%s325_s5]   ;;  %v271_v21 = vsel %vm45_vm2, %v401_v17, %v266_v18  ;;  %v407_v26 = vld [vmem:[%s738_s0 + $0x1] ss:$16 sm:%s300_s15]  }
  0x21   :  { %v328_v22 = vsel %vm35_vm0, %v412_v20, %v411_v19  ;;  %v413_v23 = vld [vmem:[%s738_s0 + $0x9] ss:$16 sm:%s330_s10]   ;;  %272 = vrot.lane.b32.xlu0 %v271_v21, %s428_s12  ;;  %v3_v33 = vld [vmem:[%s738_s0] ss:$8 sm:$0xf0]  }
  0x22   :  { %v414_v24 = vld [vmem:[%s738_s0 + $0x9] ss:$16 sm:%s335_s11]   ;;  %v333_v25 = vsel %vm40_vm1, %v413_v23, %v328_v22  ;;  %v408_v29 = vld [vmem:[%s738_s0 + $0x1] ss:$16 sm:%s303_s20]   ;;  %v5_v35 = vsel %vm4_vm3, %v3_v33, %v2_v27 }
  0x23   :  { %v338_v28 = vsel %vm45_vm2, %v414_v24, %v333_v25  ;;  %v409_v30 = vld [vmem:[%s738_s0 + $0x1] ss:$16 sm:%s308_s21]   ;;  %v306_v31 = vsel %vm35_vm0, %v408_v29, %v407_v26  ;;  %v347_v36 = vld [vmem:[%s738_s0 + $0x40] ss:$8 sm:$0xf]  }
  0x24   :  { %339 = vrot.lane.b32.xlu1 %v338_v28, %s429_s6  ;;  %v410_v32 = vld [vmem:[%s738_s0 + $0x1] ss:$16 sm:%s313_s26]   ;;  %v311_v34 = vsel %vm40_vm1, %v409_v30, %v306_v31  ;;  %v348_v37 = vld [vmem:[%s738_s0 + $0x40] ss:$8 sm:$0xf0]  }
  0x25   :  { %v316_v38 = vsel %vm45_vm2, %v410_v32, %v311_v34  ;;  %7 = vst.msk [vmem:[%s739_s1] ss:$8 sm:$0x3] %vm6_vm4, %v5_v35   ;;  %344 = vst.msk [vmem:[%s739_s1 - $0xf] ss:$8 sm:$0xc] %vm6_vm4, %v5_v35   ;;  %v19_v39 = vsel %vm4_vm3, %v348_v37, %v347_v36 }
  0x26   :  { %345 = vst.msk [vmem:[%s739_s1 - $0x1e] ss:$8 sm:$0x30] %vm6_vm4, %v5_v35   ;;  %346 = vst.msk [vmem:[%s739_s1 - $0x2d] ss:$8 sm:$0xc0] %vm6_vm4, %v5_v35   ;;  %317 = vrot.lane.b32.xlu0 %v316_v38, %s429_s6 }
  0x27   :  { %349 = vst.msk [vmem:[%s739_s1 + $0x4] ss:$8 sm:$0x3] %vm6_vm4, %v19_v39   ;;  %350 = vst.msk [vmem:[%s739_s1 - $0xb] ss:$8 sm:$0xc] %vm6_vm4, %v19_v39  }
  0x28   :  { %351 = vst.msk [vmem:[%s739_s1 - $0x1a] ss:$8 sm:$0x30] %vm6_vm4, %v19_v39   ;;  %352 = vst.msk [vmem:[%s739_s1 - $0x29] ss:$8 sm:$0xc0] %vm6_vm4, %v19_v39  }
  0x78   :  { %v93_v40 = vpop.permute.xlu1 %92  }
  0x7a   :  { %v48_v41 = vpop.permute.xlu0 %47  }
  0x7b   :  { %50 = vst.msk [vmem:[%s739_s1] sm:$0xff] %vm49_vm5, %v48_v41  }
  0x7c   :  { %95 = vst.msk [vmem:[%s739_s1] sm:$0xff] %vm94_vm6, %v93_v40  }
  0x7d   :  { %v115_v42 = vpop.permute.xlu1 %114  }
  0x7f   :  { %v70_v43 = vpop.permute.xlu0 %69  }
  0x80   :  { %361 = vst.msk [vmem:[%s739_s1 + $0x8] sm:$0xff] %vm49_vm5, %v70_v43  }
  0x81   :  { %370 = vst.msk [vmem:[%s739_s1 + $0x8] sm:$0xff] %vm94_vm6, %v115_v42  }
  0x82   :  { %v160_v44 = vpop.permute.xlu1 %159  }
  0x83   :  { %379 = vst.msk [vmem:[%s739_s1 + $0x8] sm:$0xff] %vm139_vm7, %v160_v44  }
  0x84   :  { %v138_v45 = vpop.permute.xlu0 %137  }
  0x85   :  { %140 = vst.msk [vmem:[%s739_s1] sm:$0xff] %vm139_vm7, %v138_v45  }
  0x87   :  { %v205_v46 = vpop.permute.xlu1 %204  }
  0x88   :  { %388 = vst.msk [vmem:[%s739_s1 + $0x8] sm:$0xff] %vm184_vm8, %v205_v46  }
  0x89   :  { %v183_v47 = vpop.permute.xlu0 %182  }
  0x8a   :  { %185 = vst.msk [vmem:[%s739_s1] sm:$0xff] %vm184_vm8, %v183_v47  }
  0x8c   :  { %v250_v48 = vpop.permute.xlu1 %249  }
  0x8d   :  { %397 = vst.msk [vmem:[%s739_s1 + $0x8] sm:$0xff] %vm229_vm9, %v250_v48  }
  0x8e   :  { %v228_v49 = vpop.permute.xlu0 %227  }
  0x8f   :  { %230 = vst.msk [vmem:[%s739_s1] sm:$0xff] %vm229_vm9, %v228_v49  }
  0x91   :  { %v295_v50 = vpop.permute.xlu1 %294  }
  0x92   :  { %406 = vst.msk [vmem:[%s739_s1 + $0x8] sm:$0xff] %vm274_vm10, %v295_v50  }
  0x93   :  { %v273_v51 = vpop.permute.xlu0 %272  }
  0x94   :  { %275 = vst.msk [vmem:[%s739_s1] sm:$0xff] %vm274_vm10, %v273_v51  }
  0x96   :  { %v340_v52 = vpop.permute.xlu1 %339  }
  0x97   :  { %415 = vst.msk [vmem:[%s739_s1 + $0x8] sm:$0xff] %vm319_vm11, %v340_v52  }
  0x98   :  { %v318_v53 = vpop.permute.xlu0 %317  }
  0x99   :  { %320 = vst.msk [vmem:[%s739_s1] sm:$0xff] %vm319_vm11, %v318_v53  }

// kernel: feature_extraction_forward.1
= control target key start
LH: loop header
LB: loop body
LE: loop exit
PB: predicated region body
PF: predicated region fallthrough
CT: control target
= control target key end

     0   :  { %vm47_vm0 = vcmask 1040384   ;;  %vm629_vm1 = vmmov 1   ;;  %v630_v3 = vmov 0.0   ;;  %vm43_vm3 = vcmask 72704   ;;  %s850_s1 = inlined_call_operand.vmem [shape: f32[9,1024], index: 1, kind: input, shape index: {}]   ;;  %s851_s0 = inlined_call_operand.vmem [shape: f32[4,9], index: 0, kind: input, shape index: {}]   ;;  %s852_s2 = inlined_call_operand.vmem [shape: f32[4,256], index: 2, kind: input, shape index: {}]   ;;  %s853_s3 = inlined_call_operand.vmem [shape: f32[4,256], index: 3, kind: input, shape index: {}]   ;;  %s854_s4 = inlined_call_operand.vmem [shape: f32[8,256], index: 4, kind: input, shape index: {}]   ;;  %s855_s5 = inlined_call_operand.vmem [shape: f32[8,256], index: 5, kind: input, shape index: {}]   ;;  %s856_s7 = inlined_call_operand.vmem [shape: f32[4,8,256], index: 7, kind: output, shape index: {1}]   ;;  %s857_s8 = inlined_call_operand.vmem [shape: f32[4,8,256], index: 8, kind: output, shape index: {2}]   ;;  %s858_s6 = inlined_call_operand.vmem [shape: f32[4,1024], index: 6, kind: output, shape index: {0}]  }
   0x1   :  { %v28_v0 = vld [vmem:[%s850_s1 + $0x8] sm:$0xff]  ;;  %vm683_vm2 = vmpackc.low %vm47_vm0, %vm629_vm1  ;;  %136 = vmatprep.mubr.f32.mxu0 %v630_v3  ;;  %207 = vmatprep.mubr.f32.mxu1 %v630_v3  ;;  %v30_v5 = vld [vmem:[%s850_s1 + $0x18] sm:$0xff]  ;;  %v631_v27 = vmov 1966171168   ;;  %v389_v29 = vlaneseq }
   0x2   :  { %v36_v1 = vld [vmem:[%s850_s1 + $0x48] sm:$0x1]  ;;  %v38_v6 = vld [vmem:[%s850_s1 + $0x58] sm:$0x1]  ;;  %v27_v7 = vld [vmem:[%s850_s1] sm:$0xff]  ;;  %v387_v28 = vunpack.c.l.s4 %v631_v27 }
   0x3   :  { %v602_v4 = vpack.c.bf16 %v36_v1, %v28_v0  ;;  %v608_v8 = vpack.c.bf16 %v38_v6, %v30_v5  ;;  %v35_v9 = vld [vmem:[%s850_s1 + $0x40] sm:$0x1]  ;;  %v29_v10 = vld [vmem:[%s850_s1 + $0x10] sm:$0xff]  ;;  %v32_v15 = vld [vmem:[%s850_s1 + $0x28] sm:$0xff]  ;;  %v390_v31 = vshrl.u32 %v389_v29, 7 }
   0x4   :  { %v37_v11 = vld [vmem:[%s850_s1 + $0x50] sm:$0x1]  ;;  %v605_v12 = vpack.c.bf16 %v35_v9, %v27_v7  ;;  %v26_v14 = vld [vmem:[%s851_s0] sm:$0xf]  ;;  %v40_v16 = vld [vmem:[%s850_s1 + $0x68] sm:$0x1]  ;;  %v388_v30 = vunpack.c.0.s8 %v387_v28 }
   0x5   :  { %604 = vmatprep.subr.msk.bf16.mxu0 %vm683_vm2, %v602_v4  ;;  %v611_v13 = vpack.c.bf16 %v37_v11, %v29_v10  ;;  %610 = vmatprep.subr.msk.bf16.mxu1 %vm683_vm2, %v608_v8  ;;  %v614_v17 = vpack.c.bf16 %v40_v16, %v32_v15  ;;  %v34_v18 = vld [vmem:[%s850_s1 + $0x38] sm:$0xff]  ;;  %v31_v20 = vld [vmem:[%s850_s1 + $0x20] sm:$0xff]  ;;  %v33_v23 = vld [vmem:[%s850_s1 + $0x30] sm:$0xff]  ;;  %v434_v43 = vsub.s32 0, %v390_v31  ;;  %v438_v44 = vsub.s32 1, %v390_v31 }
   0x6   :  { %v42_v19 = vld [vmem:[%s850_s1 + $0x78] sm:$0x1]  ;;  %607 = vmatpush1.bf16.msk.msra.mxu0 %vm683_vm2, %v605_v12  ;;  %v39_v22 = vld [vmem:[%s850_s1 + $0x60] sm:$0x1]  ;;  %v41_v24 = vld [vmem:[%s850_s1 + $0x70] sm:$0x1]  ;;  %v391_v35 = vsub.s32 %v388_v30, %v390_v31 }
   0x7   :  { %613 = vmatpush1.bf16.msk.msra.mxu1 %vm683_vm2, %v611_v13  ;;  %v620_v21 = vpack.c.bf16 %v42_v19, %v34_v18  ;;  %616 = vmatprep.subr.msk.bf16.mxu0 %vm683_vm2, %v614_v17  ;;  %v617_v25 = vpack.c.bf16 %v39_v22, %v31_v20  ;;  %v623_v26 = vpack.c.bf16 %v41_v24, %v33_v23  ;;  %v600_v32 = vld.sshfl [vmem:[%s852_s2] sm:$0xff pattern:$0x75316420]  ;;  %v766_v48 = vld [vmem:[%s854_s4 + $0x8] sm:$0xff] }
   0x8   :  { %v601_v33 = vld.sshfl [vmem:[%s853_s3] sm:$0xff pattern:$0x75316420]  ;;  %v385_v34 = vcombine.high %v600_v32, %v600_v32  ;;  %v392_v37 = vrot.slane %v600_v32, %v391_v35  ;;  %v431_v62 = vld [vmem:[%s855_s5 + $0x8] sm:$0xff] }
   0x9   :  { %622 = vmatprep.subr.msk.bf16.mxu1 %vm683_vm2, %v620_v21  ;;  %590 = vmatmul.mubr.msk.f32.vlgmr.msra.gmra.mrb[0].mxu0 %vm43_vm3, %v26_v14  ;;  %v411_v36 = vcombine.high %v601_v33, %v601_v33  ;;  %v418_v39 = vrot.slane %v601_v33, %v391_v35  ;;  %v761_v47 = vld [vmem:[%s854_s4] sm:$0xff] }
   0xa   :  { %593 = vmatmul.mubr.msk.f32.vlgmr.msra.gmra.mrb[0].mxu1 %vm43_vm3, %v26_v14  ;;  %619 = vmatpush1.bf16.msk.msra.mxu0 %vm683_vm2, %v617_v25  ;;  %v399_v38 = vrot.slane %v385_v34, %v391_v35  ;;  %v400_v41 = vcombine.high %v392_v37, %v392_v37  ;;  %v435_v49 = vrot.slane %v392_v37, %v434_v43  ;;  %v430_v61 = vld [vmem:[%s855_s5] sm:$0xff] }
   0xb   :  { %625 = vmatpush1.bf16.msk.msra.mxu1 %vm683_vm2, %v623_v26  ;;  %278 = vmatprep.mubr.f32.mxu0 %v630_v3  ;;  %v425_v40 = vrot.slane %v411_v36, %v391_v35  ;;  %v426_v45 = vcombine.high %v418_v39, %v418_v39  ;;  %v439_v50 = vrot.slane %v392_v37, %v438_v44 }
   0xc   :  { %349 = vmatprep.mubr.f32.mxu1 %v630_v3  ;;  %v401_v42 = vcombine.high %v399_v38, %v399_v38  ;;  %v443_v51 = vrot.slane %v399_v38, %v434_v43  ;;  %v447_v52 = vrot.slane %v399_v38, %v438_v44  ;;  %v451_v53 = vrot.slane %v400_v41, %v434_v43 }
   0xd   :  { %596 = vmatmul.mubr.msk.f32.vlgmr.msra.gmra.mrb[2].mxu0 %vm43_vm3, %v26_v14  ;;  %v427_v46 = vcombine.high %v425_v40, %v425_v40  ;;  %v455_v54 = vrot.slane %v400_v41, %v438_v44  ;;  %v472_v57 = vmul.f32 %v435_v49, %v761_v47  ;;  %v473_v58 = vmul.f32 %v439_v50, %v766_v48 }
   0xe   :  { %599 = vmatmul.mubr.msk.f32.vlgmr.msra.gmra.mrb[2].mxu1 %vm43_vm3, %v26_v14  ;;  %v459_v55 = vrot.slane %v401_v42, %v434_v43  ;;  %v463_v56 = vrot.slane %v401_v42, %v438_v44  ;;  %v474_v59 = vmul.f32 %v443_v51, %v761_v47  ;;  %v475_v60 = vmul.f32 %v447_v52, %v766_v48 }
   0xf   :  { %v476_v63 = vmul.f32 %v451_v53, %v761_v47  ;;  %v477_v0 = vmul.f32 %v455_v54, %v766_v48  ;;  %v483_v3 = vrot.slane %v418_v39, %v434_v43  ;;  %v487_v4 = vrot.slane %v418_v39, %v438_v44 }
  0x10   :  { %v478_v1 = vmul.f32 %v459_v55, %v761_v47  ;;  %v479_v2 = vmul.f32 %v463_v56, %v766_v48  ;;  %v491_v5 = vrot.slane %v425_v40, %v434_v43  ;;  %v495_v6 = vrot.slane %v425_v40, %v438_v44 }
  0x11   :  { %v499_v7 = vrot.slane %v426_v45, %v434_v43  ;;  %v503_v8 = vrot.slane %v426_v45, %v438_v44  ;;  %v507_v9 = vrot.slane %v427_v46, %v434_v43  ;;  %v511_v10 = vrot.slane %v427_v46, %v438_v44 }
  0x12   :  { %v520_v11 = vmul.f32 %v483_v3, %v430_v61  ;;  %v521_v12 = vmul.f32 %v487_v4, %v431_v62  ;;  %v522_v13 = vmul.f32 %v491_v5, %v430_v61  ;;  %v523_v14 = vmul.f32 %v495_v6, %v431_v62 }
  0x13   :  { %v524_v15 = vmul.f32 %v499_v7, %v430_v61  ;;  %v525_v16 = vmul.f32 %v503_v8, %v431_v62  ;;  %v526_v17 = vmul.f32 %v507_v9, %v430_v61  ;;  %v527_v18 = vmul.f32 %v511_v10, %v431_v62 }
  0x14   :  { %v528_v19 = vsub.f32 %v472_v57, %v520_v11  ;;  %v529_v20 = vsub.f32 %v473_v58, %v521_v12  ;;  %v530_v21 = vsub.f32 %v474_v59, %v522_v13  ;;  %v531_v22 = vsub.f32 %v475_v60, %v523_v14 }
  0x15   :  { %v532_v23 = vsub.f32 %v476_v63, %v524_v15  ;;  %v533_v24 = vsub.f32 %v477_v0, %v525_v16  ;;  %v534_v25 = vsub.f32 %v478_v1, %v526_v17  ;;  %v535_v26 = vsub.f32 %v479_v2, %v527_v18 }
  0x16   :  { %536 = vst [vmem:[%s856_s7] sm:$0xff] %v528_v19  ;;  %537 = vst [vmem:[%s856_s7 + $0x8] sm:$0xff] %v529_v20  ;;  %v544_v27 = vmul.f32 %v435_v49, %v430_v61  ;;  %v545_v28 = vmul.f32 %v439_v50, %v431_v62  ;;  %v546_v29 = vmul.f32 %v443_v51, %v430_v61 }
  0x17   :  { %538 = vst [vmem:[%s856_s7 + $0x10] sm:$0xff] %v530_v21  ;;  %539 = vst [vmem:[%s856_s7 + $0x18] sm:$0xff] %v531_v22  ;;  %v547_v30 = vmul.f32 %v447_v52, %v431_v62  ;;  %v548_v31 = vmul.f32 %v451_v53, %v430_v61  ;;  %v549_v32 = vmul.f32 %v455_v54, %v431_v62 }
  0x18   :  { %540 = vst [vmem:[%s856_s7 + $0x20] sm:$0xff] %v532_v23  ;;  %541 = vst [vmem:[%s856_s7 + $0x28] sm:$0xff] %v533_v24  ;;  %v550_v33 = vmul.f32 %v459_v55, %v430_v61  ;;  %v551_v34 = vmul.f32 %v463_v56, %v431_v62  ;;  %v552_v35 = vmul.f32 %v483_v3, %v761_v47 }
  0x19   :  { %542 = vst [vmem:[%s856_s7 + $0x30] sm:$0xff] %v534_v25  ;;  %543 = vst [vmem:[%s856_s7 + $0x38] sm:$0xff] %v535_v26  ;;  %v553_v36 = vmul.f32 %v487_v4, %v766_v48  ;;  %v554_v37 = vmul.f32 %v491_v5, %v761_v47  ;;  %v555_v38 = vmul.f32 %v495_v6, %v766_v48 }
  0x1a   :  { %v556_v39 = vmul.f32 %v499_v7, %v761_v47  ;;  %v557_v40 = vmul.f32 %v503_v8, %v766_v48  ;;  %v558_v41 = vmul.f32 %v507_v9, %v761_v47  ;;  %v559_v42 = vmul.f32 %v511_v10, %v766_v48 }
  0x1b   :  { %v560_v43 = vadd.f32 %v552_v35, %v544_v27  ;;  %v561_v44 = vadd.f32 %v553_v36, %v545_v28  ;;  %v562_v45 = vadd.f32 %v554_v37, %v546_v29  ;;  %v563_v46 = vadd.f32 %v555_v38, %v547_v30 }
  0x1c   :  { %v564_v49 = vadd.f32 %v556_v39, %v548_v31  ;;  %v565_v50 = vadd.f32 %v557_v40, %v549_v32  ;;  %v566_v51 = vadd.f32 %v558_v41, %v550_v33  ;;  %v567_v52 = vadd.f32 %v559_v42, %v551_v34 }
  0x1d   :  { %568 = vst [vmem:[%s857_s8] sm:$0xff] %v560_v43  ;;  %569 = vst [vmem:[%s857_s8 + $0x8] sm:$0xff] %v561_v44 }
  0x1e   :  { %570 = vst [vmem:[%s857_s8 + $0x10] sm:$0xff] %v562_v45  ;;  %571 = vst [vmem:[%s857_s8 + $0x18] sm:$0xff] %v563_v46 }
  0x1f   :  { %572 = vst [vmem:[%s857_s8 + $0x20] sm:$0xff] %v564_v49  ;;  %573 = vst [vmem:[%s857_s8 + $0x28] sm:$0xff] %v565_v50 }
  0x20   :  { %574 = vst [vmem:[%s857_s8 + $0x30] sm:$0xff] %v566_v51  ;;  %575 = vst [vmem:[%s857_s8 + $0x38] sm:$0xff] %v567_v52 }
  0xdc   :  { %v138_v47 = vpop.f32.mrb[0].mxu0 }
  0xdd   :  { %v209_v48 = vpop.f32.mrb[0].mxu1  ;;  %v140_v53 = vpop.f32.mrb[1].mxu0 }
  0xde   :  { %v211_v54 = vpop.f32.mrb[1].mxu1  ;;  %v364_v55 = vcombine.low %v138_v47, %v140_v53 }
  0xdf   :  { %v365_v56 = vcombine.low %v209_v48, %v211_v54 }
  0xe0   :  { %372 = vst [vmem:[%s858_s6] sm:$0xff] %v364_v55  ;;  %v280_v57 = vpop.f32.mrb[2].mxu0 }
  0xe1   :  { %373 = vst [vmem:[%s858_s6 + $0x8] sm:$0xff] %v365_v56  ;;  %v351_v58 = vpop.f32.mrb[2].mxu1  ;;  %v282_v59 = vpop.f32.mrb[3].mxu0 }
  0xe2   :  { %v353_v60 = vpop.f32.mrb[3].mxu1  ;;  %v366_v61 = vcombine.low %v280_v57, %v282_v59 }
  0xe3   :  { %v367_v62 = vcombine.low %v351_v58, %v353_v60 }
  0xe4   :  { %374 = vst [vmem:[%s858_s6 + $0x10] sm:$0xff] %v366_v61 }
  0xe5   :  { %375 = vst [vmem:[%s858_s6 + $0x18] sm:$0xff] %v367_v62 }

</bundles_post_ra>
